<compile_context>
chip_gen: v7x
topology: tpu7x:2x2x1
jax: 0.10.0
libtpu: 0.0.40
codegen_flags: <defaults>
</compile_context>

<pallas_src>
from functools import partial

import jax
import jax.numpy as jnp
from jax.experimental import pallas as pl
from jax.experimental.pallas import tpu as pltpu


def rag_retrieval_kernel(cl_ref, ce_ref, q_ref, qn_ref, sim_ref, *, nt, l_tok):
    """One grid step = (batch b, chunk-tile n): scores `nt` chunks vs. the question.

    cl_ref : VMEM (1, nt, 1) int32      per-chunk real-token counts for this tile
    ce_ref : VMEM (1, nt*l_tok, D) bf16 chunk token embeddings, flattened (chunk, token)
    q_ref  : VMEM (1, 1, D) f32         mean-pooled question embedding (per batch)
    qn_ref : VMEM (1, 1, 1) f32         ||q_embed|| (per batch)
    sim_ref: VMEM (1, 1, nt) f32        cosine similarities for this (batch, tile)
    """
    ntl = nt * l_tok
    d = ce_ref.shape[2]

    # ---- chunk attention mask rebuilt in-kernel, O(1) VPU work in nt.
    lens_col = cl_ref[0]                                              # (nt, 1) int32
    col = jax.lax.broadcasted_iota(jnp.int32, (nt, ntl), 1)           # flat token idx
    row = jax.lax.broadcasted_iota(jnp.int32, (nt, ntl), 0)           # chunk row
    lo = row * l_tok
    ce = ce_ref[0]                                                    # (ntl, D) bf16
    sel = ((col >= lo) & (col < lo + lens_col)).astype(ce.dtype)      # (nt, ntl) bf16

    # ---- mean pooling of chunk token embeddings on the MXU (RAGVT5.embed).
    summed = jnp.dot(sel, ce, preferred_element_type=jnp.float32)     # (nt, D) f32
    counts = jnp.maximum(lens_col.astype(jnp.float32), 1e-9)          # (nt, 1)
    text_embeds = summed / counts                                     # (nt, D)

    # ---- cosine similarity (RAGVT5.get_similarities), lane-dense (1, nt).
    q = q_ref[0]                                                      # (1, D) f32
    dots = jnp.einsum("qd,nd->qn", q, text_embeds,
                      preferred_element_type=jnp.float32)             # (1, nt)
    sumsq_t = jnp.einsum("qd,nd->qn", jnp.ones((1, d), jnp.float32),
                         text_embeds * text_embeds,
                         preferred_element_type=jnp.float32)          # (1, nt)
    norm_t = jnp.sqrt(sumsq_t)
    # Same op order as the reference: norm_t * norm_q + 1e-8 (matches to f32 rounding).
    denom = norm_t * qn_ref[0] + 1e-8                                 # (1, nt)
    sim_ref[...] = (dots / denom).reshape(sim_ref.shape)


def _vmem_capacity_bytes(default=64 * 1024 * 1024):
    # 64 MiB = smallest per-TensorCore VMEM across v5e/v6e/v7x -> conservative default.
    try:
        cap = int(pltpu.get_tpu_info().vmem_capacity_bytes)
        if cap > 0:
            return cap
    except Exception:
        pass
    return default


def rag_retrieval_similarities(chunk_tok_emb, chunk_lens, q_tok_emb, q_lens,
                               *, chunk_tile=None):
    """Fused mean-pool + cosine-similarity.  Returns (bs, N_chunks) float32.

    chunk_tok_emb: (bs, N, L, D)  token embeddings of every chunk (bf16 ok)
    chunk_lens   : (bs, N)        number of real tokens per chunk (int)
    q_tok_emb    : (bs, Lq, D)    question token embeddings
    q_lens       : (bs,)          number of real question tokens (int)
    chunk_tile   : chunks scored per grid step (None = auto, generation-aware)
    """
    bs, n_chunks, l_tok, d = chunk_tok_emb.shape
    lq = q_tok_emb.shape[1]

    # Pad the token axis so nt*L stays a multiple of 16 (bf16 sublane tiling).
    l_pad = ((l_tok + 15) // 16) * 16
    if l_pad != l_tok:
        chunk_tok_emb = jnp.pad(
            chunk_tok_emb, ((0, 0), (0, 0), (0, l_pad - l_tok), (0, 0)))

    vmem_cap = _vmem_capacity_bytes()

    def footprint(nt):
        est = 2 * nt * l_pad * d * chunk_tok_emb.dtype.itemsize   # dbl-buffered chunk block
        est += 2 * max(nt, 8) * 128 * 4                            # lens block (tile-padded)
        est += 2 * 8 * max(d, 128) * 4 + 2 * 8 * 128 * 4           # q_embed / q_norm blocks
        est += 2 * 8 * max(nt, 128) * 4                            # output block
        est += 4 * nt * (nt * l_pad) * 4 + 6 * nt * d * 4          # in-kernel temporaries
        return est

    # Generation-aware chunk tile: largest multiple of 8 (<=32, <= #chunks rounded
    # up to 8) whose footprint fits ~60% of this chip's VMEM.  At L=512, D=768:
    # v7x (64 MiB) -> 16; v5e/v6e (128 MiB) -> 32.
    if chunk_tile is None:
        n_cap = ((n_chunks + 7) // 8) * 8
        cand = max(8, min(32, n_cap))
        while cand > 8 and footprint(cand) > int(0.6 * vmem_cap):
            cand -= 8
        nt = cand
    else:
        nt = max(8, ((int(chunk_tile) + 7) // 8) * 8)

    nb = (n_chunks + nt - 1) // nt
    n_pad = nb * nt
    if n_pad != n_chunks:
        # Padded chunk slots get length 0 -> similarity 0 (dropped on return).
        chunk_tok_emb = jnp.pad(
            chunk_tok_emb, ((0, 0), (0, n_pad - n_chunks), (0, 0), (0, 0)))
        chunk_lens = jnp.pad(chunk_lens, ((0, 0), (0, n_pad - n_chunks)))

    # Flatten (chunk, token) so the kernel block is a plain 2-D (nt*L, D) slab.
    ce_flat = chunk_tok_emb.reshape(bs, n_pad * l_pad, d)
    cl = jnp.clip(chunk_lens, 0, l_tok).astype(jnp.int32).reshape(bs, n_pad, 1)

    # Question mean pooling + norm, once per batch (tiny (bs, Lq, D) tensor).
    qe = q_tok_emb.astype(jnp.float32)
    ql = jnp.clip(q_lens, 0, lq).astype(jnp.int32)
    qm = (jnp.arange(lq)[None, :] < ql[:, None]).astype(jnp.float32)   # (bs, Lq)
    q_sum = jnp.einsum("bl,bld->bd", qm, qe)
    q_embed = q_sum / jnp.maximum(jnp.sum(qm, axis=1, keepdims=True), 1e-9)
    q_norm = jnp.sqrt(jnp.sum(q_embed * q_embed, axis=-1, keepdims=True))
    q_embed = q_embed[:, None, :].astype(jnp.float32)                 # (bs, 1, D)
    q_norm = q_norm[:, None, :].astype(jnp.float32)                   # (bs, 1, 1)

    est = footprint(nt)
    vmem_limit = int(min(max(int(est * 1.25), 32 * 1024 * 1024),
                         int(0.85 * vmem_cap)))

    kernel = partial(rag_retrieval_kernel, nt=nt, l_tok=l_pad)
    out = pl.pallas_call(
        kernel,
        out_shape=jax.ShapeDtypeStruct((bs, nb, nt), jnp.float32),
        grid_spec=pltpu.PrefetchScalarGridSpec(
            num_scalar_prefetch=0,
            grid=(bs, nb),
            in_specs=[
                pl.BlockSpec((1, nt, 1), lambda b, n: (b, n, 0)),
                pl.BlockSpec((1, nt * l_pad, d), lambda b, n: (b, n, 0)),
                pl.BlockSpec((1, 1, d), lambda b, n: (b, 0, 0)),
                pl.BlockSpec((1, 1, 1), lambda b, n: (b, 0, 0)),
            ],
            out_specs=pl.BlockSpec((1, 1, nt), lambda b, n: (b, n, 0)),
        ),
        compiler_params=pltpu.CompilerParams(
            # Per-(b, n) output block -> both axes independent, so the chunk-tile
            # axis can be split across TensorCores (v7x megacore) even at bs=1.
            dimension_semantics=("parallel", "parallel"),
            vmem_limit_bytes=vmem_limit),
    )(cl, ce_flat, q_embed, q_norm)

    return out.reshape(bs, n_pad)[:, :n_chunks]


def reference_similarities(chunk_tok_emb, chunk_lens, q_tok_emb, q_lens):
    """Pure-JAX reference mirroring RAGVT5.embed (mean pooling) + get_similarities."""
    ce = chunk_tok_emb.astype(jnp.float32)
    qe = q_tok_emb.astype(jnp.float32)
    l_tok, lq = ce.shape[2], qe.shape[1]
    cm = (jnp.arange(l_tok)[None, None, :] < chunk_lens[..., None]).astype(jnp.float32)
    qm = (jnp.arange(lq)[None, :] < q_lens[:, None]).astype(jnp.float32)
    text = jnp.sum(ce * cm[..., None], axis=2) / jnp.maximum(
        jnp.sum(cm, axis=2, keepdims=True), 1e-9)                    # (bs, N, D)
    q = jnp.sum(qe * qm[..., None], axis=1) / jnp.maximum(
        jnp.sum(qm, axis=1, keepdims=True), 1e-9)                    # (bs, D)
    dots = jnp.einsum("bnd,bd->bn", text, q)
    norm_t = jnp.linalg.norm(text, axis=-1)
    norm_q = jnp.linalg.norm(q, axis=-1, keepdims=True)
    return dots / (norm_t * norm_q + 1e-8)


if __name__ == "__main__":
    key = jax.random.PRNGKey(0)
    bs, n_chunks, l_tok, lq, d, vocab, topk = 2, 16, 16, 16, 128, 64, 5

    k_emb, k_cid, k_qid, k_cl, k_ql = jax.random.split(key, 5)

    # Deterministic "nn.Embedding" table (generator.language_backbone.shared).
    emb_table = jax.random.normal(k_emb, (vocab, d), dtype=jnp.float32) * 0.02

    chunk_ids = jax.random.randint(k_cid, (bs, n_chunks, l_tok), 0, vocab)
    q_ids = jax.random.randint(k_qid, (bs, lq), 0, vocab)

    # Ragged lengths (tokenizer padding simulated via per-chunk token counts).
    chunk_lens = jax.random.randint(k_cl, (bs, n_chunks), 3, l_tok + 1)
    q_lens = jax.random.randint(k_ql, (bs,), 3, lq + 1)

    # Glue: embedding lookup (gather), shipped to the kernel in bf16.
    chunk_tok_emb = jnp.take(emb_table, chunk_ids, axis=0).astype(jnp.bfloat16)
    q_tok_emb = jnp.take(emb_table, q_ids, axis=0).astype(jnp.bfloat16)

    sims = rag_retrieval_similarities(chunk_tok_emb, chunk_lens, q_tok_emb, q_lens)
    sims = jax.block_until_ready(sims)

    ref = reference_similarities(chunk_tok_emb, chunk_lens, q_tok_emb, q_lens)
    assert sims.shape == (bs, n_chunks)
    assert jnp.allclose(sims, ref, atol=1e-4, rtol=1e-4), (sims, ref)

    # Glue: torch.topk equivalent used by RAGVT5.retrieve.  Empty / fully padded
    # chunk slots are masked so they can never be retrieved.
    scored = jnp.where(chunk_lens > 0, sims, -jnp.inf)
    _, top_k_idx = jax.lax.top_k(scored, min(topk, n_chunks))
    jax.block_until_ready(top_k_idx)

    print("KERNEL_OK")
</pallas_src>

<mosaic_0001>
module attributes {stable_mosaic.version = 11 : i64} {
  func.func @rag_retrieval_kernel(%arg0: i32, %arg1: i32, %arg2: memref<1x16x1xi32, #tpu.memory_space<vmem>>, %arg3: memref<1x256x128xbf16, #tpu.memory_space<vmem>>, %arg4: memref<1x1x128xf32, #tpu.memory_space<vmem>>, %arg5: memref<1x1x1xf32, #tpu.memory_space<vmem>>, %arg6: memref<1x1x16xf32, #tpu.memory_space<vmem>>) attributes {dimension_semantics = [#tpu.dimension_semantics<parallel>, #tpu.dimension_semantics<parallel>], iteration_bounds = array<i64: 2, 1>, scalar_prefetch = 0 : i64, scratch_operands = 0 : i64, tpu.core_type = #tpu.core_type<tc>, window_params = [{transform_indices = @transform_0, window_bounds = array<i64: 1, 16, 1>}, {transform_indices = @transform_1, window_bounds = array<i64: 1, 256, 128>}, {transform_indices = @transform_2, window_bounds = array<i64: 1, 1, 128>}, {transform_indices = @transform_3, window_bounds = array<i64: 1, 1, 1>}, {transform_indices = @transform_4, window_bounds = array<i64: 1, 1, 16>}]} {
    %c0 = arith.constant 0 : index
    %c0_0 = arith.constant 0 : index
    %c0_1 = arith.constant 0 : index
    %0 = vector.load %arg2[%c0, %c0_0, %c0_1] : memref<1x16x1xi32, #tpu.memory_space<vmem>>, vector<1x16x1xi32>
    %1 = vector.shape_cast %0 : vector<1x16x1xi32> to vector<16x1xi32>
    %2 = tpu.iota {dimensions = array<i32: 1>} : vector<16x256xi32>
    %3 = tpu.iota {dimensions = array<i32: 0>} : vector<16x256xi32>
    %c16_i32 = arith.constant 16 : i32
    %4 = vector.broadcast %c16_i32 : i32 to vector<16x256xi32>
    %5 = arith.muli %3, %4 : vector<16x256xi32>
    %c0_2 = arith.constant 0 : index
    %c0_3 = arith.constant 0 : index
    %c0_4 = arith.constant 0 : index
    %6 = vector.load %arg3[%c0_2, %c0_3, %c0_4] : memref<1x256x128xbf16, #tpu.memory_space<vmem>>, vector<1x256x128xbf16>
    %7 = vector.shape_cast %6 : vector<1x256x128xbf16> to vector<256x128xbf16>
    %8 = arith.cmpi sge, %2, %5 : vector<16x256xi32>
    %9 = vector.broadcast %1 : vector<16x1xi32> to vector<16x256xi32>
    %10 = arith.addi %5, %9 : vector<16x256xi32>
    %11 = arith.cmpi slt, %2, %10 : vector<16x256xi32>
    %12 = arith.andi %8, %11 : vector<16x256xi1>
    %13 = arith.extui %12 : vector<16x256xi1> to vector<16x256xi32>
    %14 = arith.sitofp %13 : vector<16x256xi32> to vector<16x256xf32>
    %15 = arith.truncf %14 : vector<16x256xf32> to vector<16x256xbf16>
    %cst = arith.constant dense<0.000000e+00> : vector<16x128xf32>
    %16 = tpu.matmul %15, %7, %cst {dimension_numbers = #tpu.dot_dimension_numbers<[1], [0], [0], [1], [0, 0, 1, 1], [], []>} : vector<16x256xbf16>, vector<256x128xbf16>, vector<16x128xf32> -> vector<16x128xf32>
    %17 = arith.sitofp %1 : vector<16x1xi32> to vector<16x1xf32>
    %cst_5 = arith.constant 9.99999971E-10 : f32
    %18 = vector.broadcast %cst_5 : f32 to vector<16x1xf32>
    %19 = arith.maximumf %17, %18 : vector<16x1xf32>
    %20 = vector.broadcast %19 : vector<16x1xf32> to vector<16x128xf32>
    %21 = arith.divf %16, %20 : vector<16x128xf32>
    %c0_6 = arith.constant 0 : index
    %c0_7 = arith.constant 0 : index
    %c0_8 = arith.constant 0 : index
    %22 = vector.load %arg4[%c0_6, %c0_7, %c0_8] : memref<1x1x128xf32, #tpu.memory_space<vmem>>, vector<1x1x128xf32>
    %23 = vector.shape_cast %22 : vector<1x1x128xf32> to vector<1x128xf32>
    "tpu.trace_start"() <{level = 10 : i32, message = "qd,nd->qn"}> : () -> ()
    %cst_9 = arith.constant dense<0.000000e+00> : vector<1x16xf32>
    %24 = tpu.matmul %23, %21, %cst_9 {dimension_numbers = #tpu.dot_dimension_numbers<[1], [1], [0], [0], [0, 0, 1, 0], [], []>} : vector<1x128xf32>, vector<16x128xf32>, vector<1x16xf32> -> vector<1x16xf32>
    %cst_10 = arith.constant 1.000000e+00 : f32
    "tpu.trace_stop"() : () -> ()
    %25 = vector.broadcast %cst_10 : f32 to vector<1x128xf32>
    %26 = arith.mulf %21, %21 : vector<16x128xf32>
    "tpu.trace_start"() <{level = 10 : i32, message = "qd,nd->qn"}> : () -> ()
    %cst_11 = arith.constant dense<0.000000e+00> : vector<1x16xf32>
    %27 = tpu.matmul %25, %26, %cst_11 {dimension_numbers = #tpu.dot_dimension_numbers<[1], [1], [0], [0], [0, 0, 1, 0], [], []>} : vector<1x128xf32>, vector<16x128xf32>, vector<1x16xf32> -> vector<1x16xf32>
    "tpu.trace_stop"() : () -> ()
    %28 = math.sqrt %27 : vector<1x16xf32>
    %c0_12 = arith.constant 0 : index
    %c0_13 = arith.constant 0 : index
    %c0_14 = arith.constant 0 : index
    %29 = vector.load %arg5[%c0_12, %c0_13, %c0_14] : memref<1x1x1xf32, #tpu.memory_space<vmem>>, vector<1x1x1xf32>
    %30 = vector.shape_cast %29 : vector<1x1x1xf32> to vector<1x1xf32>
    %31 = vector.broadcast %30 : vector<1x1xf32> to vector<1x16xf32>
    %32 = arith.mulf %28, %31 : vector<1x16xf32>
    %cst_15 = arith.constant 9.99999993E-9 : f32
    %33 = vector.broadcast %cst_15 : f32 to vector<1x16xf32>
    %34 = arith.addf %32, %33 : vector<1x16xf32>
    %35 = arith.divf %24, %34 : vector<1x16xf32>
    %36 = vector.shape_cast %35 : vector<1x16xf32> to vector<1x1x16xf32>
    %c0_16 = arith.constant 0 : index
    %c0_17 = arith.constant 0 : index
    %c0_18 = arith.constant 0 : index
    %37 = vector.load %arg6[%c0_16, %c0_17, %c0_18] : memref<1x1x16xf32, #tpu.memory_space<vmem>>, vector<1x1x16xf32>
    tpu.vector_store %arg6[%c0_16, %c0_17, %c0_18], %36 {strides = array<i32>} : memref<1x1x16xf32, #tpu.memory_space<vmem>>, vector<1x1x16xf32>,
    return
  }
  func.func @transform_0(%arg0: i32, %arg1: i32) -> (i32, i32, i32) {
    %c0_i32 = arith.constant 0 : i32
    %c0_i32_0 = arith.constant 0 : i32
    return %arg0, %arg1, %c0_i32 : i32, i32, i32
  }
  func.func @transform_1(%arg0: i32, %arg1: i32) -> (i32, i32, i32) {
    %c0_i32 = arith.constant 0 : i32
    %c0_i32_0 = arith.constant 0 : i32
    return %arg0, %arg1, %c0_i32 : i32, i32, i32
  }
  func.func @transform_2(%arg0: i32, %arg1: i32) -> (i32, i32, i32) {
    %c0_i32 = arith.constant 0 : i32
    %c0_i32_0 = arith.constant 0 : i32
    %c0_i32_1 = arith.constant 0 : i32
    return %arg0, %c0_i32, %c0_i32_0 : i32, i32, i32
  }
  func.func @transform_3(%arg0: i32, %arg1: i32) -> (i32, i32, i32) {
    %c0_i32 = arith.constant 0 : i32
    %c0_i32_0 = arith.constant 0 : i32
    %c0_i32_1 = arith.constant 0 : i32
    return %arg0, %c0_i32, %c0_i32_0 : i32, i32, i32
  }
  func.func @transform_4(%arg0: i32, %arg1: i32) -> (i32, i32, i32) {
    %c0_i32 = arith.constant 0 : i32
    %c0_i32_0 = arith.constant 0 : i32
    return %arg0, %arg1, %c0_i32 : i32, i32, i32
  }
}

</mosaic_0001>

<bundles_post_ra>
// kernel: tpu_custom_call.1
= control target key start
LH: loop header
LB: loop body
LE: loop exit
PB: predicated region body
PF: predicated region fallthrough
CT: control target
= control target key end

     0   :  { %9 = vsyncpa [#allocation3], 0  ;;  %s1368_s0 = inlined_call_operand.vmem [shape: s32[2,16,1], index: 0, kind: input, shape index: {}]   ;;  %s1369_s1 = inlined_call_operand.hbm [shape: bf16[2,256,128], index: 1, kind: input, shape index: {}]   ;;  %s1370_s2 = inlined_call_operand.vmem [shape: f32[2,1,128], index: 2, kind: input, shape index: {}]   ;;  %s1371_s3 = inlined_call_operand.vmem [shape: f32[2,1,1], index: 3, kind: input, shape index: {}]   ;;  %s1372_s4 = inlined_call_operand.hbm [shape: f32[2,1,16], index: 4, kind: output, shape index: {}]  }
   0x1   :  { %11 = vsyncpa [#allocation3 + $0x1], 0 }
   0x2   :  { %12 = vsyncpa [#allocation4], 0 }
   0x3   :  { %14 = vsyncpa [#allocation4 + $0x1], 0  ;;  %s1153_s15 = smov 0   ;;  %s1155_s16 = smov 0  }
   0x4   :  { %s1157_s17 = smov 0   ;;  %s1159_s18 = smov 0  }
   0x5   :  { %s1161_s19 = smov 0   ;;  %s1163_s20 = smov 0  }
   0x6 LB: > { %s820_s21 = sadd.s32 4294967295, %s1116_s20   ;;  %s821_s22 = sadd.s32 4294967294, %s1116_s20   ;;  %s1116_s20 = sphi %s1163_s20, %s20_s20   ;;  %s1112_s19 = sphi %s1161_s19, %s1387_s19   ;;  %s1108_s18 = sphi %s1159_s18, %s1386_s18   ;;  %s1104_s17 = sphi %s1157_s17, %s1385_s17   ;;  %s1100_s16 = sphi %s1155_s16, %s1384_s16   ;;  %s1096_s15 = sphi %s1153_s15, %s1383_s15  }
   0x7   : > { %s32_s23 = sadd.s32 1, %s1112_s19  ;;  %s69_s24 = sadd.s32 1, %s1104_s17 }
   0x8   : > { %p34_p0 = scmp.ge.s32.totalorder %s32_s23, 2  ;;  %p76_p1 = scmp.ne.s32.totalorder %s1104_s17, %s1100_s16 }
   0x9   : > { %p77_p2 = scmp.eq.s32.totalorder %s1116_s20, 0  ;;  %p82_p3 = scmp.ne.s32.totalorder %s1100_s16, %s1096_s15 }
   0xa   : > { %s1389_s23 = smov (%p34_p0, %s32_s23), 0  ;;  %p83_p5 = scmp.eq.s32.totalorder %s820_s21, 0 }
   0xb   : > { %p1194_p4 = por %p77_p2, %p76_p1  ;;  %s64_s26 = ssub.s32 %s1112_s19, %s1389_s23 }
   0xc   : > { %p160_p6 = scmp.eq.s32.totalorder %s820_s21, 1  ;;  %p67_p7 = scmp.eq.s32.totalorder %s64_s26, 0 }
   0xd   : > { %p1200_p8 = por %p83_p5, %p82_p3  ;;  %p166_p10 = scmp.eq.s32.totalorder %s821_s22, 1 }
   0xe   : > { %p1204_p9 = por %p160_p6, %p76_p1  ;;  %p920_p13 = scmp.lt.s32.totalorder %s1116_s20, 2 }
   0xf   : > { %s1209_s29 = scalar_select %p67_p7, %s1104_s17, %s69_s24  }
  0x10   : > { %s1376_s28 = scalar_select %p1204_p9, 1, 0 }
  0x11   : > { %p1211_p11 = por %p166_p10, %p82_p3  ;;  %s199_s5 = sand.u32 1, %s1104_s17  }
  0x12   : > { %s824_s6 = sshll.u32 %s199_s5, 7  ;;  %s858_s7 = sshll.u32 %s1112_s19, 11 }
  0x13   : > { %s1377_s30 = scalar_select %p1211_p11, 1, 0 }
  0x14   : > { %s1222_s10 = scalar_lea.hbm %s1369_s1, %s858_s7  ;;  %s203_s11 = scalar_lea.vmem [#allocation2], %s824_s6 }
  0x15   : > { %s212_s12 = sshll.u32 %s203_s11, 4  ;;  %p1228_p0 = pnand %p920_p13, %p1194_p4  ;;  %s1224_s12 = int_to_ptr.vmem [resolvable:$true] %s212_s12 }
  0x16   : > { %s1233_s14 = scalar_lea.sflag [#allocation3], %s199_s5  ;;  %s1004_s21 = scalar_lea.hbm %s1222_s10, 2048 }
  0x17   : > { %p1005_p2 = scmp.ne.s32.totalorder %s1222_s10, %s1004_s21  ;;  %p1006_p3 = pneg %p1228_p0 }
  0x18   : > { %s1009_s25 = scalar_lea.hbm %s1369_s1, 4096  ;;  %p1010_p4 = scmp.lt.u32.totalorder %s1222_s10, %s1369_s1 }
  0x19   : > { %p1007_p5 = pnand %p1006_p3, %p1005_p2  ;;  %p1011_p7 = scmp.lt.u32.totalorder %s1009_s25, %s1004_s21 }
  0x1a   : > { %p1013_p13 = scmp.lt.u32.totalorder %s1004_s21, %s1222_s10 }
  0x1b   : > { %p1008_p6 = pneg %p1007_p5  ;;  %p1012_p10 = por %p1011_p7, %p1010_p4 }
  0x1d   : > { %p1014_p12 = por %p1013_p13, %p1012_p10 }
  0x1f   : > { %p1015_p1 = pnand %p1014_p12, %p1008_p6 }
  0x21   : > { %1018 = shalt.err (!%p1015_p1)
}
  0x22   : > { %s1019_s5 = scalar_lea.vmem %s1224_s12, 2048  ;;  %s1118_s7 = smov [#allocation2]  }
  0x23   : > { %p1020_p2 = scmp.ne.s32.totalorder %s1224_s12, %s1019_s5  ;;  %s1024_s8 = sshll.u32 %s1118_s7, 4  ;;  %s1025_s8 = int_to_ptr.vmem [resolvable:$false] %s1024_s8 }
  0x24   : > { %s1026_s9 = scalar_lea.vmem %s1025_s8, 4096  ;;  %p1027_p9 = scmp.lt.s32.totalorder %s1224_s12, %s1025_s8 }
  0x25   : > { %p1022_p5 = pnand %p1020_p2, %p1006_p3  ;;  %p1028_p4 = scmp.lt.s32.totalorder %s1026_s9, %s1019_s5 }
  0x27   : > { %p1023_p11 = pneg %p1022_p5  ;;  %p1029_p7 = por %p1028_p4, %p1027_p9 }
  0x29   : > { %p1030_p10 = pnand %p1029_p7, %p1023_p11 }
  0x2b   : > { %1033 = shalt.err (!%p1030_p10)
}
  0x2c   : > { %s1119_s11 = smov 64   ;;  %s1120_s21 = smov 4  }
  0x2d   : > { %915 = dma.hbm_to_vmem [thread:$0]  (!%p1228_p0), %s1222_s10, 2048, %s1224_s12, %s1233_s14, %s1119_s11, %s1119_s11, %s1120_s21  }
  0x2e   : > { %p232_p12 = scmp.lt.s32.totalorder %s1116_s20, 3  ;;  %p1379_p1 = scmp.ge.s32.totalorder %s1116_s20, 1 }
  0x30   : > { %p233_p3 = pnand %p1379_p1, %p232_p12 }
  0x31   : > { %s1265_s22 = sand.u32 (!%p233_p3), 1, %s1100_s16  }
  0x32   : > { %236 = sbr.rel (%p233_p3) target bundleno = 698 (0x2ba), region = 36  ;;  %s828_s24 = sshll.u32 (!%p233_p3), %s1265_s22, 7 }
  0x33   : > { %s239_s25 = scalar_lea.sflag (!%p233_p3), [#allocation3], %s1265_s22  ;;  %s1269_s26 = scalar_lea.vmem (!%p233_p3), [#allocation2], %s828_s24 }
  0x39   : > { %1087 = dma.done.wait (%p1200_p8), %s239_s25, 2048  }
  0x3a   : > { %1089 = vsyncadd (%p1200_p8), %s239_s25, 4294965248  ;;  %p282_p9 = scmp.lt.s32.totalorder %s1108_s18, 1  ;;  %v1121_v0 = vmov 0   ;;  %v980_v3 = vld [vmem:[%s1269_s26 + $0x40] sm:$0xff]   ;;  %v982_v6 = vld [vmem:[%s1269_s26 + $0x48] sm:$0xff]   ;;  %v301_v24 = vlaneseq  ;;  %v1123_v36 = vmov 0.0|0.0  }
  0x3b   : > { %978 = vset.pattern.permute.xlu0 %v1121_v0  ;;  %979 = vset.pattern.permute.xlu1 %v1121_v0  ;;  %v981_v4 = vld [vmem:[%s1269_s26] sm:$0xff]   ;;  %v983_v7 = vld [vmem:[%s1269_s26 + $0x8] sm:$0xff]   ;;  %v984_v8 = vld [vmem:[%s1269_s26 + $0x50] sm:$0xff]   ;;  %v1122_v35 = vmov 1.0|1.0   ;;  %vm1124_vm14 = vmmov 0  }
  0x3c   : > { %s1277_s10 = scalar_select %p282_p9, %s1108_s18, 1  ;;  %860 = vmatprep.subr.bf16.mxu0 %v980_v3  ;;  %v985_v9 = vld [vmem:[%s1269_s26 + $0x10] sm:$0xff]   ;;  %v986_v10 = vld [vmem:[%s1269_s26 + $0x58] sm:$0xff]   ;;  %v988_v13 = vld [vmem:[%s1269_s26 + $0x60] sm:$0xff]   ;;  %v1303_v25 = vshrl.u32 %v301_v24, 7  ;;  %v302_v26 = vand.u32 127, %v301_v24  ;;  %902 = vmatprep.subr.bf16.mxu1 %v1123_v36 }
  0x3d   : > { %861 = vmatpush3.bf16.msra.mxu0 %v981_v4  ;;  %v987_v11 = vld [vmem:[%s1269_s26 + $0x18] sm:$0xff]   ;;  %v989_v15 = vld [vmem:[%s1269_s26 + $0x20] sm:$0xff]   ;;  %v990_v16 = vld [vmem:[%s1269_s26 + $0x68] sm:$0xff]   ;;  %v1125_v37 = vmov 0.0   ;;  %v1126_v55 = vmov 1.0   ;;  %s855_s21 = sshll.u32 %s1108_s18, 4 }
  0x3e   : > { %s859_s12 = sshll.u32 %s1277_s10, 4  ;;  %s297_s7 = scalar_lea.vmem %s1371_s3, %s1277_s10  ;;  %862 = vmatprep.subr.bf16.mxu0 %v982_v6  ;;  %v991_v19 = vld [vmem:[%s1269_s26 + $0x28] sm:$0xff]   ;;  %v992_v20 = vld [vmem:[%s1269_s26 + $0x70] sm:$0xff]   ;;  %v994_v22 = vld [vmem:[%s1269_s26 + $0x78] sm:$0xff]   ;;  %v307_v27 = vmul.u32 16, %v1303_v25  ;;  %v306_v28 = vadd.s32 8, %v1303_v25  ;;  %892 = vmatprep.mubr.msk.f32.mxu1 %vm1124_vm14, %v1125_v37 }
  0x3f   : > { %s289_s27 = scalar_lea.vmem %s1368_s0, %s859_s12  ;;  %v676_v5 = vld [vmem:[%s297_s7] sm:$0x1]  ;;  %v993_v21 = vld [vmem:[%s1269_s26 + $0x30] sm:$0xff]   ;;  %v995_v23 = vld [vmem:[%s1269_s26 + $0x38] sm:$0xff]   ;;  %v303_v30 = vadd.s32 128, %v302_v26  ;;  %s294_s11 = scalar_lea.vmem %s1370_s2, %s1277_s10  ;;  %v684_v60 = vsub.s32 0, %v1303_v25 }
  0x40   : > { %v299_v1 = vld [vmem:[%s289_s27] sm:$0xff]  ;;  %v300_v2 = vld [vmem:[%s289_s27 + $0x8] sm:$0xff]  ;;  %v308_v32 = vmul.u32 16, %v306_v28  ;;  %vm341_vm0 = vcmp.ge.s32.totalorder %v302_v26, %v307_v27  ;;  %s280_s24 = scalar_lea.vmem [#allocation5], %s1265_s22  ;;  %s1319_s12 = scalar_lea.hbm %s1372_s4, %s855_s21 }
  0x41   : > { %346 = vperm.xlu0 %978, %v299_v1   ;;  %863 = vmatpush3.bf16.msra.mxu0 %v983_v7  ;;  %v508_v12 = vcvt.s32.f32 %v299_v1  ;;  %v509_v14 = vcvt.s32.f32 %v300_v2  ;;  %vm342_vm2 = vcmp.ge.s32.totalorder %v303_v30, %v307_v27  ;;  %v526_v54 = vld [vmem:[%s294_s11] sm:$0x1]  ;;  %s706_s25 = sshll.u32 %s280_s24, 4  ;;  %s693_s13 = scalar_lea.sflag [#allocation4], %s1265_s22  ;;  %s1321_s25 = int_to_ptr.vmem [resolvable:$true] %s706_s25 }
  0x42   : > { %864 = vmatprep.subr.bf16.mxu0 %v984_v8  ;;  %vm343_vm4 = vcmp.ge.s32.totalorder %v302_v26, %v308_v32  ;;  %vm344_vm6 = vcmp.ge.s32.totalorder %v303_v30, %v308_v32  ;;  %s1034_s14 = scalar_lea.vmem %s1321_s25, 16  ;;  %p1380_p11 = scmp.ne.s32.totalorder %s1376_s28, 0 }
  0x43   : > { %v510_v17 = vmax.f32 %v508_v12, 1e-09  ;;  %v511_v18 = vmax.f32 %v509_v14, 1e-09  ;;  %p1035_p8 = scmp.ne.s32.totalorder %s1321_s25, %s1034_s14  ;;  %s1127_s18 = smov [#allocation5]  }
  0x44   : > { %s1038_s27 = sshll.u32 %s1127_s18, 4  ;;  %s1039_s27 = int_to_ptr.vmem [resolvable:$false] %s1038_s27 }
  0x45   : > { %349 = vperm.xlu0 %978, %v300_v2   ;;  %865 = vmatpush3.bf16.msra.mxu0 %v985_v9  ;;  %p1036_p0 = pnand %p1035_p8, %p1380_p11  ;;  %s1040_s6 = scalar_lea.vmem %s1039_s27, 32 }
  0x46   : > { %866 = vmatprep.subr.bf16.mxu0 %v986_v10  ;;  %514 = vperm.xlu1 %979, %v510_v17   ;;  %p1041_p13 = scmp.lt.s32.totalorder %s1321_s25, %s1039_s27  ;;  %p1042_p2 = scmp.lt.s32.totalorder %s1040_s6, %s1034_s14 }
  0x47   : > { %p1037_p6 = pneg %p1036_p0 }
  0x48   : > { %p1043_p5 = por %p1042_p2, %p1041_p13 }
  0x49   : > { %679 = vperm.xlu0 %978, %v676_v5   ;;  %867 = vmatpush3.bf16.msra.mxu0 %v987_v11 }
  0x4a   : > { %868 = vmatprep.subr.bf16.mxu0 %v988_v13  ;;  %519 = vperm.xlu1 %979, %v511_v18   ;;  %p1044_p4 = pnand %p1043_p5, %p1037_p6 }
  0x4d   : > { %869 = vmatpush3.bf16.msra.mxu0 %v989_v15 }
  0x4e   : > { %870 = vmatprep.subr.bf16.mxu0 %v990_v16 }
  0x51   : > { %871 = vmatpush3.bf16.msra.mxu0 %v991_v19 }
  0x52   : > { %872 = vmatprep.subr.bf16.mxu0 %v992_v20 }
  0x55   : > { %873 = vmatpush3.bf16.msra.mxu0 %v993_v21 }
  0x56   : > { %874 = vmatprep.subr.bf16.mxu0 %v994_v22 }
  0x59   : > { %875 = vmatpush3.bf16.msra.mxu0 %v995_v23 }
  0xc0   : > { %v347_v29 = vpop.permute.xlu0 %346 }
  0xc1   : > { %v351_v31 = vadd.s32 %v347_v29, %v307_v27 }
  0xc3   : > { %vm353_vm1 = vcmp.lt.s32.totalorder %v302_v26, %v351_v31  ;;  %vm354_vm3 = vcmp.lt.s32.totalorder %v303_v30, %v351_v31 }
  0xc4   : > { %v350_v33 = vpop.permute.xlu0 %349  ;;  %vm357_vm5 = vmand %vm341_vm0, %vm353_vm1  ;;  %vm690_vm1 = vcmask 122880  }
  0xc5   : > { %v352_v34 = vadd.s32 %v350_v33, %v308_v32  ;;  %vm358_vm9 = vmand %vm342_vm2, %vm354_vm3  ;;  %v515_v38 = vpop.permute.xlu1 %514 }
  0xc6   : > { %996 = vrcp.f32 %v515_v38 }
  0xc7   : > { %vm355_vm7 = vcmp.lt.s32.totalorder %v302_v26, %v352_v34  ;;  %vm356_vm8 = vcmp.lt.s32.totalorder %v303_v30, %v352_v34 }
  0xc8   : > { %vm359_vm10 = vmand %vm343_vm4, %vm355_vm7  ;;  %v680_v62 = vpop.permute.xlu0 %679 }
  0xc9   : > { %vm360_vm11 = vmand %vm344_vm6, %vm356_vm8  ;;  %v520_v39 = vpop.permute.xlu1 %519  ;;  %v685_v1 = vrot.slane %v680_v62, %v684_v60 }
  0xca   : > { %vm851_vm12 = vmpackc.low %vm360_vm11, %vm358_vm9  ;;  %998 = vrcp.f32 %v520_v39 }
  0xcb   : > { %852 = vmatprep.mubr.msk.bf16.mxu0 %vm851_vm12, %v1122_v35  ;;  %vm853_vm13 = vmpackc.low %vm359_vm10, %vm357_vm5 }
  0xcc   : > { %854 = vmatmul.mubr.msk.bf16.vlgmr.msra.gmra.mrb[0].mxu0 %vm853_vm13, %v1122_v35 }
  0xd0   : > { %v997_v44 = vpop.eup %996 }
  0xd4   : > { %v999_v48 = vpop.eup %998 }
 0x19f   : > { %v876_v40 = vpop.f32.mrb[0].mxu0 }
 0x1a0   : > { %v877_v41 = vpop.f32.mrb[1].mxu0 }
 0x1a1   : > { %v878_v42 = vadd.f32 %v877_v41, %v876_v40  ;;  %v879_v43 = vpop.f32.mrb[2].mxu0 }
 0x1a2   : > { %v880_v45 = vpop.f32.mrb[3].mxu0 }
 0x1a3   : > { %v523_v46 = vmul.f32 %v997_v44, %v878_v42  ;;  %v881_v47 = vadd.f32 %v880_v45, %v879_v43 }
 0x1a5   : > { %v525_v49 = vmul.f32 %v999_v48, %v881_v47  ;;  %v597_v50 = vmul.f32 %v523_v46, %v523_v46 }
 0x1a7   : > { %v598_v51 = vmul.f32 %v525_v49, %v525_v49  ;;  %v903_v52 = vpack.c.bf16 %v525_v49, %v523_v46 }
 0x1a9   : > { %v906_v53 = vpack.c.bf16 %v598_v51, %v597_v50  ;;  %904 = vmatpush3.bf16.xpose.msra.mxu1 %v903_v52 }
 0x1aa   : > { %905 = vmatprep.subr.bf16.mxu1 %v1123_v36 }
 0x1b0   : > { %893 = vmatmul.mubr.f32.vlgmr.msra.gmra.mrb[0].mxu1 %v526_v54 }
 0x1b1   : > { %907 = vmatpush3.bf16.xpose.msra.mxu1 %v906_v53  ;;  %899 = vmatprep.mubr.msk.f32.mxu1 %vm1124_vm14, %v1125_v37 }
 0x1b8   : > { %900 = vmatmul.mubr.f32.vlgmr.msra.gmra.mrb[2].mxu1 %v1126_v55 }
 0x283   : > { %v593_v56 = vpop.f32.mrb[0].mxu1 }
 0x284   : > { %v894_v57 = vpop.f32.mrb[1].mxu1 }
 0x28b   : > { %v665_v58 = vpop.f32.mrb[2].mxu1 }
 0x28c   : > { %1000 = vrsqrt.f32 %v665_v58  ;;  %v901_v59 = vpop.f32.mrb[3].mxu1  ;;  %vm671_vm15 = vcmp.eq.f32.partialorder %v665_v58, inf  ;;  %v674_v0 = vand.u32 2147483648, %v665_v58  ;;  %vm673_vm0 = vcmp.eq.f32.partialorder %v665_v58, 0.0 }
 0x296   : > { %v1001_v61 = vpop.eup %1000 }
 0x297   : > { %v670_v63 = vmul.f32 %v1001_v61, %v665_v58 }
 0x299   : > { %v672_v2 = vsel %vm671_vm15, %v665_v58, %v670_v63 }
 0x29a   : > { %v675_v3 = vsel %vm673_vm0, %v674_v0, %v672_v2 }
 0x29b   : > { %v686_v4 = vmul.f32 %v685_v1, %v675_v3 }
 0x29d   : > { %v687_v5 = vadd.f32 1e-08, %v686_v4 }
 0x29f   : > { %1002 = vrcp.f32 %v687_v5 }
 0x2a9   : > { %v1003_v6 = vpop.eup %1002 }
 0x2aa   : > { %v689_v7 = vmul.f32 %v1003_v6, %v593_v56 }
 0x2ac   : > { %691 = vst.msk [vmem:[%s280_s24] sm:$0x1] %vm690_vm1, %v689_v7 }
 0x2ad   : > { %1047 = shalt.err (!%p1044_p4)
}
 0x2ae   : > { %s1048_s22 = scalar_lea.hbm %s1319_s12, 16  ;;  %s1052_s8 = scalar_lea.hbm %s1372_s4, 32 }
 0x2af   : > { %p1049_p7 = scmp.ne.s32.totalorder %s1319_s12, %s1048_s22  ;;  %p1053_p1 = scmp.lt.u32.totalorder %s1319_s12, %s1372_s4 }
 0x2b0   : > { %p1054_p3 = scmp.lt.u32.totalorder %s1052_s8, %s1048_s22  ;;  %p1056_p8 = scmp.lt.u32.totalorder %s1048_s22, %s1319_s12 }
 0x2b1   : > { %p1050_p10 = pnand %p1049_p7, %p1380_p11 }
 0x2b2   : > { %p1055_p9 = por %p1054_p3, %p1053_p1 }
 0x2b3   : > { %p1051_p12 = pneg %p1050_p10 }
 0x2b4   : > { %p1057_p0 = por %p1056_p8, %p1055_p9 }
 0x2b6   : > { %p1058_p6 = pnand %p1057_p0, %p1051_p12 }
 0x2b8   : > { %1061 = shalt.err (!%p1058_p6)
}
 0x2b9   : > { %910 = dma.vmem_to_hbm [thread:$0]  (%p1380_p11), %s1321_s25, 16, %s1319_s12, %s693_s13  }
 0x2ba PF: > { %s718_s21 = sand.u32 1, %s1096_s15   ;;  %p1381_p13 = scmp.ne.s32.totalorder %s1377_s30, 0 }
 0x2bb   : > { %p1382_p2 = scmp.ge.s32.totalorder %s1116_s20, 2  ;;  %s719_s24 = scalar_lea.sflag [#allocation4], %s718_s21 }
 0x2bd   : > { %p917_p5 = pnand %p1382_p2, %p1381_p13 }
 0x2bf   : > { %1091 = dma.done.wait (!%p917_p5), %s719_s24, 16  }
 0x2c0   : > { %1093 = vsyncadd (!%p917_p5), %s719_s24, 4294967280  ;;  %s20_s20 = sadd.s32 1, %s1116_s20   ;;  %s1383_s15 = smov %s1100_s16 }
 0x2c1   : > { %p17_p4 = scmp.ge.s32.totalorder %s20_s20, 4   ;;  %s1384_s16 = smov %s1104_s17 }
 0x2c2   : > { %s1385_s17 = smov %s1209_s29  ;;  %s1386_s18 = smov %s1112_s19 }
 0x2c3   : > { %s1387_s19 = smov %s1389_s23  ;;  %19 = sbr.rel (!%p17_p4) target bundleno = 6 (0x6), region = 90 }
 0x2ca   :  { %723 = vsyncpa [#allocation3], 1 }
 0x2cb   :  { %725 = vsyncpa [#allocation3 + $0x1], 1 }
 0x2cc   :  { %726 = vsyncpa [#allocation4], 1 }
 0x2cd   :  { %728 = vsyncpa [#allocation4 + $0x1], 1 }

</bundles_post_ra>
